<compile_context>
chip_gen: v5e
topology: v5e:2x2
jax: 0.10.0
libtpu: 0.0.40
codegen_flags: <defaults>
</compile_context>

<pallas_src>
import functools
import math

import jax
import jax.numpy as jnp
import numpy as np
from jax.experimental import pallas as pl
from jax.experimental.pallas import tpu as pltpu


def _round_up(x, m):
    return ((x + m - 1) // m) * m


# ---------------------------------------------------------------------------
# Prep kernel: roi-tile-invariant work, executed once (not once per N tile).
# ---------------------------------------------------------------------------
def prep_kernel(nongt_ref, wk_ref, bk_ref, wcat_ref, kt_ref, vproj_ref):
    """nongt [Mp,F] bf16, wk [dim1,F] bf16, bk [dim1,1] f32, wcat [F,dim2] bf16
       -> kt [dim1,Mp] bf16 (pre-transposed keys, bias folded in)
          vproj [Mp,dim2] bf16 (value features already conv-projected)."""
    nongt = nongt_ref[...]                                             # [Mp, F]
    kt = jax.lax.dot_general(
        wk_ref[...], nongt, (((1,), (1,)), ((), ())),
        preferred_element_type=jnp.float32) + bk_ref[...]              # [dim1, Mp]
    kt_ref[...] = kt.astype(kt_ref.dtype)

    # single MXU call (N = dim2), no per-group loop / concatenate
    vproj_ref[...] = jnp.dot(nongt, wcat_ref[...],
                             preferred_element_type=jnp.float32
                             ).astype(vproj_ref.dtype)                 # [Mp, dim2]


# ---------------------------------------------------------------------------
# Main kernel: one roi tile per grid step.
# ---------------------------------------------------------------------------
def attention_kernel(roi_ref, pos_ref, wp_ref, bp_ref, wqt_ref, bq_ref,
                     kt_ref, vproj_ref, bc_ref, out_ref, *, nongt_dim, group):
    f32, bf16 = jnp.float32, jnp.bfloat16
    tN, F = roi_ref.shape
    _, Mp, E = pos_ref.shape
    G = group
    dim0 = wqt_ref.shape[1]
    dg = dim0 // G
    dim2 = vproj_ref.shape[1]
    dg2 = dim2 // G
    scale = 1.0 / math.sqrt(float(dg))

    pos = pos_ref[...]                                                 # [tN, Mp, E] bf16

    # position_fc for all groups: ONE batched MXU dot with wp as the LHS so
    # the result lands directly in [tN, G, Mp] (Mp lane-minor, no swapaxes).
    # The wp broadcast is tiny (G*E bf16 per row) and is what dot_general
    # strictly needs for the batched form.
    wp_b = jnp.broadcast_to(wp_ref[...][None], (tN, G, E))             # bf16
    pf = jax.lax.dot_general(
        wp_b, pos, (((2,), (2,)), ((0,), (0,))),
        preferred_element_type=f32)                                    # [tN, G, Mp]
    # relu fused with the 1e-6 clamp: max(relu(x), 1e-6) == max(x, 1e-6)
    pf = jnp.maximum(pf + bp_ref[...], 1e-6)

    # query projection for all groups in one MXU matmul
    q_all = jnp.dot(roi_ref[...], wqt_ref[...],
                    preferred_element_type=f32) + bq_ref[...]          # [tN, dim0] f32
    q_all = q_all.astype(bf16)

    kt = kt_ref[...]                                                   # [dim1, Mp] bf16
    vproj = vproj_ref[...]                                             # [Mp, dim2] bf16

    # additive key-padding mask, built once and reused by every group; it also
    # keeps amax (and hence the exp scaling / denominator) exact.
    if Mp > nongt_dim:
        col = jax.lax.broadcasted_iota(jnp.int32, (1, Mp), 1)
        neg = jnp.where(col < nongt_dim, 0.0, -1e30).astype(f32)       # [1, Mp]
    else:
        neg = None

    outs = []
    for g in range(G):                                                 # G small & static
        q_g = q_all[:, g * dg:(g + 1) * dg]                            # [tN, dg] bf16
        # keys already [dg, Mp]: natural [*,K]x[K,*] MXU shape, sublane-aligned slice
        aff = jnp.dot(q_g, kt[g * dg:(g + 1) * dg, :],
                      preferred_element_type=f32) * scale              # [tN, Mp] f32
        if neg is not None:
            aff = aff + neg
        amax = jnp.max(aff, axis=-1, keepdims=True)
        # exp(log(max(pf,1e-6)) + aff - amax) == pf * exp(aff - amax)
        e = pf[:, g, :] * jnp.exp(aff - amax)
        denom = jnp.sum(e, axis=-1, keepdims=True)
        soft = (e * pl.reciprocal(denom, approx=True)).astype(bf16)    # [tN, Mp]
        outs.append(jnp.dot(soft, vproj[:, g * dg2:(g + 1) * dg2],
                            preferred_element_type=f32))               # [tN, dg2]

    # single full-width store per tile (bias add hoisted out of the loop)
    out = jnp.concatenate(outs, axis=-1) + bc_ref[...]                 # [tN, dim2]
    out_ref[...] = out.astype(out_ref.dtype)


# ---------------------------------------------------------------------------
# Wrapper: parameter layout plumbing, padding, two pallas_calls.
# ---------------------------------------------------------------------------
def attention_module_multi_head(roi_feat, position_embedding, params,
                                nongt_dim, fc_dim, feat_dim,
                                dim=(32, 32, 32), group=4, block_rows=None):
    assert fc_dim == group, "fc_dim != group"
    assert dim[0] == dim[1], "Matrix multiply requires same dimensions!"
    wp, bp, wq, bq, wk, bk, wc, bc = params

    N, F = roi_feat.shape
    assert F == feat_dim
    M = nongt_dim
    assert position_embedding.shape[1] == M and N >= M
    E = position_embedding.shape[2]
    G = group
    dim0, dim1, dim2 = dim
    f32, bf16 = jnp.float32, jnp.bfloat16

    # -- Mp: lane axis of kt/pf/aff and K depth of soft@vproj. Prefer full
    #    128-lane alignment when nongt_dim is small or the pos-stream
    #    inflation stays modest; otherwise settle for sublane (8) alignment.
    Mp8, Mp128 = _round_up(M, 8), _round_up(M, 128)
    Mp = Mp128 if (M <= 128 or Mp128 <= Mp8 + Mp8 // 4) else Mp8

    # -- generation-aware VMEM budget / tile size --------------------------------
    try:
        vmem_cap = int(pltpu.get_tpu_info().vmem_capacity_bytes)
    except Exception:  # conservative fallback (v7x-sized VMEM)
        vmem_cap = 64 * 1024 * 1024
    vmem_limit = int(min(vmem_cap * 3 // 4, 96 * 1024 * 1024))

    Np8 = _round_up(N, 8)
    if block_rows is None:
        const_bytes = 2 * ((dim1 + dim2) * Mp + G * E + F * dim0) + (1 << 20)
        row_bytes = (2 * 2 * Mp * E            # pos tile, bf16, double-buffered
                     + 2 * 2 * F               # roi tile, bf16, double-buffered
                     + 4 * 8 * Mp              # pf (G padded to 8 sublanes), f32
                     + 4 * 6 * Mp              # aff / e / soft temporaries, f32
                     + 4 * (dim0 + 3 * dim2))  # q_all + output (+ write buffer)
        budget = max(vmem_limit - const_bytes, 2 * 1024 * 1024)
        block_rows = (budget // row_bytes) // 8 * 8
        block_rows = max(8, min(block_rows, 1024))
    # Guarantee >= 2 grid steps so the "parallel" axis can be sharded across
    # both TensorCores on dual-core parts (v7x); ~free on single-core chips.
    if Np8 >= 16:
        block_rows = min(block_rows, _round_up((Np8 + 1) // 2, 8))
    block_rows = max(8, _round_up(min(block_rows, Np8), 8))
    Np = _round_up(N, block_rows)

    # -- padding + bf16 storage (halves the dominant pos HBM stream) -------------
    roi_p = jnp.pad(roi_feat, ((0, Np - N), (0, 0))).astype(bf16)
    pos_p = jnp.pad(position_embedding,
                    ((0, Np - N), (0, Mp - M), (0, 0))).astype(bf16)
    nongt_p = jnp.pad(roi_feat[:M], ((0, Mp - M), (0, 0))).astype(bf16)

    # -- weight layout plumbing (no compute) --------------------------------------
    wqt = wq.T.astype(bf16)                                    # [F, dim0]
    # grouped 1x1 conv reassociated into one [F, dim2] matrix: wcat = wc2d^T
    wcat = wc.reshape(dim2, feat_dim).T.astype(bf16)           # [F, dim2]
    wk_b = wk.astype(bf16)                                     # [dim1, F]
    wp_b = wp.astype(bf16)                                     # [G, E]
    bk_col = bk.reshape(dim1, 1).astype(f32)
    bp3 = bp.reshape(1, G, 1).astype(f32)
    bq2 = bq.reshape(1, dim0).astype(f32)
    bc2 = bc.reshape(1, dim2).astype(f32)

    vmem = pltpu.MemorySpace.VMEM

    # -- prep call (once): keys^T + conv-projected values -------------------------
    kt, vproj = pl.pallas_call(
        prep_kernel,
        out_shape=(jax.ShapeDtypeStruct((dim1, Mp), bf16),
                   jax.ShapeDtypeStruct((Mp, dim2), bf16)),
        in_specs=[pl.BlockSpec(memory_space=vmem)] * 4,
        out_specs=(pl.BlockSpec(memory_space=vmem),
                   pl.BlockSpec(memory_space=vmem)),
    )(nongt_p, wk_b, bk_col, wcat)

    # -- main call: grid over roi tiles --------------------------------------------
    grid = (Np // block_rows,)
    kernel = functools.partial(attention_kernel, nongt_dim=M, group=G)

    flops = int(2 * Np * (F * dim0 + G * E * Mp + dim0 * Mp + Mp * dim2))
    bytes_accessed = int(2 * (Np * F + Np * Mp * E + dim1 * Mp + Mp * dim2
                              + G * E + F * dim0)
                         + 4 * (Np * dim2 + G + dim0 + dim2 + dim1))
    cost = pl.CostEstimate(flops=flops,
                           transcendentals=int(Np * (G * Mp + G)),
                           bytes_accessed=bytes_accessed)

    out_p = pl.pallas_call(
        kernel,
        out_shape=jax.ShapeDtypeStruct((Np, dim2), f32),
        grid=grid,
        in_specs=[
            pl.BlockSpec((block_rows, F), lambda i: (i, 0)),           # roi tile
            pl.BlockSpec((block_rows, Mp, E), lambda i: (i, 0, 0)),    # pos tile
            pl.BlockSpec((G, E), lambda i: (0, 0)),                    # wp
            pl.BlockSpec((1, G, 1), lambda i: (0, 0, 0)),              # bp
            pl.BlockSpec((F, dim0), lambda i: (0, 0)),                 # wq^T
            pl.BlockSpec((1, dim0), lambda i: (0, 0)),                 # bq
            pl.BlockSpec((dim1, Mp), lambda i: (0, 0)),                # kt
            pl.BlockSpec((Mp, dim2), lambda i: (0, 0)),                # vproj
            pl.BlockSpec((1, dim2), lambda i: (0, 0)),                 # bc
        ],
        out_specs=pl.BlockSpec((block_rows, dim2), lambda i: (i, 0)),
        compiler_params=pltpu.CompilerParams(
            dimension_semantics=("parallel",),
            vmem_limit_bytes=vmem_limit),
        cost_estimate=cost,
    )(roi_p, pos_p, wp_b, bp3, wqt, bq2, kt, vproj, bc2)

    return out_p[:N]


# ---------------------------------------------------------------------------
# Pure-JAX transcription of the PyTorch forward (validation reference, f32).
# ---------------------------------------------------------------------------
def reference_forward(roi_feat, position_embedding, params,
                      nongt_dim, fc_dim, feat_dim, dim, group):
    wp, bp, wq, bq, wk, bk, wc, bc = params
    emb_dim = position_embedding.shape[2]
    dg0 = dim[0] // group
    dg1 = dim[1] // group
    dg2 = dim[2] // fc_dim

    nongt = roi_feat[:nongt_dim]
    pe2 = position_embedding.reshape(-1, emb_dim)
    pf = jnp.maximum(pe2 @ wp.T + bp, 0.0)
    aff_weight = pf.reshape(-1, nongt_dim, fc_dim).transpose(0, 2, 1)

    q = roi_feat @ wq.T + bq
    qb = q.reshape(-1, group, dg0).transpose(1, 0, 2)
    k = nongt @ wk.T + bk
    kb = k.reshape(-1, group, dg1).transpose(1, 0, 2)

    aff = jnp.einsum('gnd,gmd->gnm', qb, kb) * (1.0 / math.sqrt(float(dg1)))
    aff_scale = aff.transpose(1, 0, 2)

    weighted = jnp.log(jnp.maximum(aff_weight, 1e-6)) + aff_scale
    soft = jax.nn.softmax(weighted, axis=2)
    out_t = soft.reshape(-1, nongt_dim) @ nongt
    out_t = out_t.reshape(-1, fc_dim * feat_dim)

    w2 = wc.reshape(dim[2], feat_dim)
    outs = []
    for g in range(fc_dim):
        outs.append(out_t[:, g * feat_dim:(g + 1) * feat_dim]
                    @ w2[g * dg2:(g + 1) * dg2].T)
    return jnp.concatenate(outs, axis=1) + bc


def _make_case(key, num_rois, nongt_dim, feat_dim, emb_dim, fc_dim, dim):
    keys = jax.random.split(key, 10)
    roi_feat = jax.random.normal(keys[0], (num_rois, feat_dim), jnp.float32)
    position_embedding = jax.random.uniform(
        keys[1], (num_rois, nongt_dim, emb_dim), jnp.float32)
    wp = 0.1 * jax.random.normal(keys[2], (fc_dim, emb_dim), jnp.float32)
    bp = 0.05 * jax.random.normal(keys[3], (fc_dim,), jnp.float32)
    wq = 0.1 * jax.random.normal(keys[4], (dim[0], feat_dim), jnp.float32)
    bq = 0.05 * jax.random.normal(keys[5], (dim[0],), jnp.float32)
    wk = 0.1 * jax.random.normal(keys[6], (dim[1], feat_dim), jnp.float32)
    bk = 0.05 * jax.random.normal(keys[7], (dim[1],), jnp.float32)
    wc = 0.1 * jax.random.normal(keys[8], (dim[2], feat_dim, 1, 1), jnp.float32)
    bc = 0.05 * jax.random.normal(keys[9], (dim[2],), jnp.float32)
    return roi_feat, position_embedding, (wp, bp, wq, bq, wk, bk, wc, bc)


if __name__ == "__main__":
    key = jax.random.PRNGKey(0)
    k1, k2 = jax.random.split(key)

    feat_dim, emb_dim = 32, 64
    group = fc_dim = 4
    dim = (32, 32, 32)

    # tolerance 2e-2: bf16 MXU operands + EUP approximate reciprocal vs f32 ref
    TOL = 2e-2

    # Case 1: aligned roi count; auto tile-size heuristic (grid of 2 tiles).
    roi, pos, params = _make_case(k1, 16, 8, feat_dim, emb_dim, fc_dim, dim)
    out = attention_module_multi_head(roi, pos, params,
                                      nongt_dim=8, fc_dim=fc_dim,
                                      feat_dim=feat_dim, dim=dim, group=group)
    out = jax.block_until_ready(out)
    ref = reference_forward(roi, pos, params, 8, fc_dim, feat_dim, dim, group)
    np.testing.assert_allclose(np.asarray(out), np.asarray(ref),
                               rtol=TOL, atol=TOL)

    # Case 2: ragged shapes (num_rois / nongt_dim not tile aligned) to exercise
    # the pad + additive key-mask path, explicit block_rows.
    roi2, pos2, params2 = _make_case(k2, 13, 6, feat_dim, emb_dim, fc_dim, dim)
    out2 = attention_module_multi_head(roi2, pos2, params2,
                                       nongt_dim=6, fc_dim=fc_dim,
                                       feat_dim=feat_dim, dim=dim, group=group,
                                       block_rows=8)
    out2 = jax.block_until_ready(out2)
    ref2 = reference_forward(roi2, pos2, params2, 6, fc_dim, feat_dim, dim, group)
    np.testing.assert_allclose(np.asarray(out2), np.asarray(ref2),
                               rtol=TOL, atol=TOL)

    print("KERNEL_OK")
</pallas_src>

<mosaic_0001>
module attributes {stable_mosaic.version = 11 : i64} {
  func.func @prep_kernel(%arg0: memref<128x32xbf16, #tpu.memory_space<vmem>>, %arg1: memref<32x32xbf16, #tpu.memory_space<vmem>>, %arg2: memref<32x1xf32, #tpu.memory_space<vmem>>, %arg3: memref<32x32xbf16, #tpu.memory_space<vmem>>, %arg4: memref<32x128xbf16, #tpu.memory_space<vmem>>, %arg5: memref<128x32xbf16, #tpu.memory_space<vmem>>) attributes {dimension_semantics = [], scalar_prefetch = 0 : i64, scratch_operands = 0 : i64, tpu.core_type = #tpu.core_type<tc>} {
    %c0 = arith.constant 0 : index
    %c0_0 = arith.constant 0 : index
    %0 = vector.load %arg0[%c0, %c0_0] : memref<128x32xbf16, #tpu.memory_space<vmem>>, vector<128x32xbf16>
    %c0_1 = arith.constant 0 : index
    %c0_2 = arith.constant 0 : index
    %1 = vector.load %arg1[%c0_1, %c0_2] : memref<32x32xbf16, #tpu.memory_space<vmem>>, vector<32x32xbf16>
    %cst = arith.constant dense<0.000000e+00> : vector<32x128xf32>
    %2 = tpu.matmul %1, %0, %cst {dimension_numbers = #tpu.dot_dimension_numbers<[1], [1], [0], [0], [0, 0, 1, 0], [], []>} : vector<32x32xbf16>, vector<128x32xbf16>, vector<32x128xf32> -> vector<32x128xf32>
    %c0_3 = arith.constant 0 : index
    %c0_4 = arith.constant 0 : index
    %3 = vector.load %arg2[%c0_3, %c0_4] : memref<32x1xf32, #tpu.memory_space<vmem>>, vector<32x1xf32>
    %4 = vector.broadcast %3 : vector<32x1xf32> to vector<32x128xf32>
    %5 = arith.addf %2, %4 : vector<32x128xf32>
    %6 = arith.truncf %5 : vector<32x128xf32> to vector<32x128xbf16>
    %c0_5 = arith.constant 0 : index
    %c0_6 = arith.constant 0 : index
    %7 = vector.load %arg4[%c0_5, %c0_6] : memref<32x128xbf16, #tpu.memory_space<vmem>>, vector<32x128xbf16>
    tpu.vector_store %arg4[%c0_5, %c0_6], %6 {strides = array<i32>} : memref<32x128xbf16, #tpu.memory_space<vmem>>, vector<32x128xbf16>,
    %c0_7 = arith.constant 0 : index
    %c0_8 = arith.constant 0 : index
    %8 = vector.load %arg3[%c0_7, %c0_8] : memref<32x32xbf16, #tpu.memory_space<vmem>>, vector<32x32xbf16>
    %cst_9 = arith.constant dense<0.000000e+00> : vector<128x32xf32>
    %9 = tpu.matmul %0, %8, %cst_9 {dimension_numbers = #tpu.dot_dimension_numbers<[1], [0], [0], [1], [0, 0, 1, 1], [], []>} : vector<128x32xbf16>, vector<32x32xbf16>, vector<128x32xf32> -> vector<128x32xf32>
    %10 = arith.truncf %9 : vector<128x32xf32> to vector<128x32xbf16>
    %c0_10 = arith.constant 0 : index
    %c0_11 = arith.constant 0 : index
    %11 = vector.load %arg5[%c0_10, %c0_11] : memref<128x32xbf16, #tpu.memory_space<vmem>>, vector<128x32xbf16>
    tpu.vector_store %arg5[%c0_10, %c0_11], %10 {strides = array<i32>} : memref<128x32xbf16, #tpu.memory_space<vmem>>, vector<128x32xbf16>,
    return
  }
}

</mosaic_0001>

<bundles_post_ra>
// kernel: tpu_custom_call.1
= control target key start
LH: loop header
LB: loop body
LE: loop exit
PB: predicated region body
PF: predicated region fallthrough
CT: control target
= control target key end

     0   :  { %vm115_vm0 = vcmask 261120   ;;  %s583_s0 = inlined_call_operand.vmem [shape: bf16[128,32], index: 0, kind: input, shape index: {}]   ;;  %s584_s1 = inlined_call_operand.vmem [shape: bf16[32,32], index: 1, kind: input, shape index: {}]   ;;  %s585_s2 = inlined_call_operand.vmem [shape: f32[32,1], index: 2, kind: input, shape index: {}]   ;;  %s586_s3 = inlined_call_operand.vmem [shape: bf16[32,32], index: 3, kind: input, shape index: {}]   ;;  %s587_s4 = inlined_call_operand.hbm [shape: bf16[32,128], index: 4, kind: output, shape index: {0}]   ;;  %s588_s5 = inlined_call_operand.vmem [shape: bf16[128,32], index: 5, kind: output, shape index: {1}]  }
   0x1   :  { %v358_v0 = vld [vmem:[%s583_s0 + $0x38] sm:$0xff]  ;;  %v362_v1 = vld [vmem:[%s586_s3 + $0x8] sm:$0xff]  ;;  %v361_v3 = vld [vmem:[%s586_s3] sm:$0xff] }
   0x2   :  { %v144_v2 = vsel %vm115_vm0, %v358_v0, 0  ;;  %382 = vmatpush.bf16.msra.mxu2 %v362_v1  ;;  %195 = vmatpush.bf16.msra.mxu1 %v362_v1 }
   0x3   :  { %146 = vmatpush.bf16.xpose.msra.mxu0 %v144_v2  ;;  %374 = vmatpush.bf16.xpose.msra.mxu3 %v144_v2 }
   0x4   :  { %11 = vsyncpa [#allocation3], 0  ;;  %v357_v4 = vld [vmem:[%s583_s0 + $0x30] sm:$0xff]  ;;  %v355_v5 = vld [vmem:[%s583_s0 + $0x20] sm:$0xff]  ;;  %v416_v17 = vmov 0   ;;  %vm254_vm1 = vcmask 257024  }
   0x5   :  { %v351_v6 = vld [vmem:[%s583_s0] sm:$0xff]  ;;  %v141_v7 = vsel %vm115_vm0, %v357_v4, 0  ;;  %v356_v8 = vld [vmem:[%s583_s0 + $0x28] sm:$0xff]  ;;  %v135_v11 = vsel %vm115_vm0, %v355_v5, 0  ;;  %v354_v12 = vld [vmem:[%s583_s0 + $0x18] sm:$0xff]  ;;  %389 = vset.pattern.permute.xlu1 %v416_v17  ;;  %388 = vset.pattern.permute.xlu0 %v416_v17  ;;  %s417_s25 = smov [#allocation2]  }
   0x6   :  { %383 = vmatpush.bf16.msra.mxu2 %v361_v3  ;;  %196 = vmatpush.bf16.msra.mxu1 %v361_v3  ;;  %v138_v9 = vsel %vm115_vm0, %v356_v8, 0  ;;  %v352_v10 = vld [vmem:[%s583_s0 + $0x8] sm:$0xff]  ;;  %v132_v13 = vsel %vm115_vm0, %v354_v12, 0  ;;  %v43_v14 = vld [vmem:[%s585_s2 + $0x10] sm:$0xff]  ;;  %v41_v15 = vld [vmem:[%s585_s2] sm:$0xff]  ;;  %v123_v22 = vsel %vm115_vm0, %v351_v6, 0 }
   0x7   :  { %v353_v16 = vld [vmem:[%s583_s0 + $0x10] sm:$0xff]  ;;  %57 = vperm.xlu1 %389, %v43_v14   ;;  %47 = vperm.xlu0 %388, %v41_v15   ;;  %v44_v19 = vld [vmem:[%s585_s2 + $0x18] sm:$0xff]  ;;  %v42_v20 = vld [vmem:[%s585_s2 + $0x8] sm:$0xff]  ;;  %v126_v21 = vsel %vm115_vm0, %v352_v10, 0  ;;  %s277_s28 = sshll.u32 %s587_s4, 4  ;;  %s418_s29 = smov 64   ;;  %s278_s28 = int_to_ptr.hbm [resolvable:$true] %s277_s28 }
   0x8   :  { %v129_v18 = vsel %vm115_vm0, %v353_v16, 0  ;;  %v359_v23 = vld [vmem:[%s584_s1] sm:$0xff]  ;;  %v360_v24 = vld [vmem:[%s584_s1 + $0x8] sm:$0xff]  ;;  %s275_s1 = sshll.u32 %s417_s25, 4  ;;  %s276_s1 = int_to_ptr.vmem [resolvable:$true] %s275_s1 }
   0x9   :  { %347 = vmatmul.msk.bf16.vlgmr.msra.gmra.mxu2 %vm115_vm0, %v355_v5  ;;  %343 = vmatmul.msk.bf16.vlgmr.msra.gmra.mxu1 %vm115_vm0, %v351_v6 }
   0xb   :  { %147 = vmatpush.bf16.xpose.msra.mxu0 %v141_v7  ;;  %375 = vmatpush.bf16.xpose.msra.mxu3 %v141_v7 }
   0xf   :  { %62 = vperm.xlu1 %389, %v44_v19   ;;  %52 = vperm.xlu0 %388, %v42_v20  }
  0x13   :  { %148 = vmatpush.bf16.xpose.msra.mxu0 %v138_v9  ;;  %376 = vmatpush.bf16.xpose.msra.mxu3 %v138_v9 }
  0x19   :  { %348 = vmatmul.msk.bf16.gmra.mxu2 %vm115_vm0, %v356_v8  ;;  %344 = vmatmul.msk.bf16.gmra.mxu1 %vm115_vm0, %v352_v10 }
  0x1b   :  { %149 = vmatpush.bf16.xpose.msra.mxu0 %v135_v11  ;;  %377 = vmatpush.bf16.xpose.msra.mxu3 %v135_v11 }
  0x23   :  { %150 = vmatpush.bf16.xpose.msra.mxu0 %v132_v13  ;;  %378 = vmatpush.bf16.xpose.msra.mxu3 %v132_v13 }
  0x29   :  { %349 = vmatmul.msk.bf16.gmra.mxu2 %vm115_vm0, %v357_v4  ;;  %345 = vmatmul.msk.bf16.gmra.mxu1 %vm115_vm0, %v353_v16 }
  0x2b   :  { %151 = vmatpush.bf16.xpose.msra.mxu0 %v129_v18  ;;  %379 = vmatpush.bf16.xpose.msra.mxu3 %v129_v18 }
  0x33   :  { %152 = vmatpush.bf16.xpose.msra.mxu0 %v126_v21  ;;  %380 = vmatpush.bf16.xpose.msra.mxu3 %v126_v21 }
  0x39   :  { %350 = vmatmul.msk.bf16.gmra.mxu2 %vm115_vm0, %v358_v0  ;;  %346 = vmatmul.msk.bf16.gmra.mxu1 %vm115_vm0, %v354_v12 }
  0x3b   :  { %153 = vmatpush.bf16.xpose.msra.mxu0 %v123_v22  ;;  %381 = vmatpush.bf16.xpose.msra.mxu3 %v123_v22 }
  0x42   :  { %333 = vmatmul.msk.bf16.vlgmr.msra.gmra.mxu0 %vm115_vm0, %v359_v23  ;;  %334 = vmatmul.msk.bf16.vlgmr.msra.gmra.mxu3 %vm115_vm0, %v360_v24 }
  0x79   :  { %v48_v52 = vpop.permute.xlu0 %47  ;;  %v58_v57 = vpop.permute.xlu1 %57 }
  0x81   :  { %v53_v61 = vpop.permute.xlu0 %52  ;;  %v63_v2 = vpop.permute.xlu1 %62 }
  0x86   :  { %v198_v25 = vpop.f32.mrf.mxu1 }
  0x87   :  { %v238_v26 = vpack.c.bf16 %v198_v25, %v198_v25 }
  0x89   :  { %255 = vst.msk [vmem:[%s588_s5] sm:$0xf] %vm254_vm1, %v238_v26 }
  0x8c   :  { %v218_v27 = vpop.f32.mrf.mxu2 }
  0x8d   :  { %v246_v28 = vpack.c.bf16 %v218_v27, %v218_v27 }
  0x8e   :  { %v200_v29 = vpop.f32.mrf.mxu1 }
  0x8f   :  { %263 = vst.msk [vmem:[%s588_s5 + $0x20] sm:$0xf] %vm254_vm1, %v246_v28  ;;  %v239_v30 = vpack.c.bf16 %v200_v29, %v200_v29 }
  0x91   :  { %256 = vst.msk [vmem:[%s588_s5 + $0x4] sm:$0xf] %vm254_vm1, %v239_v30 }
  0x94   :  { %v220_v31 = vpop.f32.mrf.mxu2 }
  0x95   :  { %v247_v32 = vpack.c.bf16 %v220_v31, %v220_v31 }
  0x96   :  { %v203_v33 = vpop.f32.mrf.mxu1 }
  0x97   :  { %264 = vst.msk [vmem:[%s588_s5 + $0x24] sm:$0xf] %vm254_vm1, %v247_v32  ;;  %v240_v34 = vpack.c.bf16 %v203_v33, %v203_v33 }
  0x99   :  { %257 = vst.msk [vmem:[%s588_s5 + $0x8] sm:$0xf] %vm254_vm1, %v240_v34 }
  0x9c   :  { %v223_v35 = vpop.f32.mrf.mxu2 }
  0x9d   :  { %v248_v36 = vpack.c.bf16 %v223_v35, %v223_v35 }
  0x9e   :  { %v205_v37 = vpop.f32.mrf.mxu1 }
  0x9f   :  { %265 = vst.msk [vmem:[%s588_s5 + $0x28] sm:$0xf] %vm254_vm1, %v248_v36  ;;  %v241_v38 = vpack.c.bf16 %v205_v37, %v205_v37 }
  0xa1   :  { %258 = vst.msk [vmem:[%s588_s5 + $0xc] sm:$0xf] %vm254_vm1, %v241_v38 }
  0xa4   :  { %v225_v39 = vpop.f32.mrf.mxu2 }
  0xa5   :  { %v249_v40 = vpack.c.bf16 %v225_v39, %v225_v39 }
  0xa6   :  { %v208_v41 = vpop.f32.mrf.mxu1 }
  0xa7   :  { %266 = vst.msk [vmem:[%s588_s5 + $0x2c] sm:$0xf] %vm254_vm1, %v249_v40  ;;  %v242_v42 = vpack.c.bf16 %v208_v41, %v208_v41 }
  0xa9   :  { %259 = vst.msk [vmem:[%s588_s5 + $0x10] sm:$0xf] %vm254_vm1, %v242_v42 }
  0xac   :  { %v228_v43 = vpop.f32.mrf.mxu2 }
  0xad   :  { %v250_v44 = vpack.c.bf16 %v228_v43, %v228_v43 }
  0xae   :  { %v210_v45 = vpop.f32.mrf.mxu1 }
  0xaf   :  { %267 = vst.msk [vmem:[%s588_s5 + $0x30] sm:$0xf] %vm254_vm1, %v250_v44  ;;  %v243_v46 = vpack.c.bf16 %v210_v45, %v210_v45 }
  0xb1   :  { %260 = vst.msk [vmem:[%s588_s5 + $0x14] sm:$0xf] %vm254_vm1, %v243_v46 }
  0xb4   :  { %v230_v47 = vpop.f32.mrf.mxu2 }
  0xb5   :  { %v251_v48 = vpack.c.bf16 %v230_v47, %v230_v47 }
  0xb6   :  { %v213_v49 = vpop.f32.mrf.mxu1 }
  0xb7   :  { %268 = vst.msk [vmem:[%s588_s5 + $0x34] sm:$0xf] %vm254_vm1, %v251_v48  ;;  %v244_v50 = vpack.c.bf16 %v213_v49, %v213_v49 }
  0xb9   :  { %261 = vst.msk [vmem:[%s588_s5 + $0x18] sm:$0xf] %vm254_vm1, %v244_v50 }
  0xbc   :  { %v233_v51 = vpop.f32.mrf.mxu2 }
  0xbd   :  { %v252_v53 = vpack.c.bf16 %v233_v51, %v233_v51 }
  0xbe   :  { %v215_v54 = vpop.f32.mrf.mxu1 }
  0xbf   :  { %v155_v55 = vpop.f32.mrf.mxu0  ;;  %269 = vst.msk [vmem:[%s588_s5 + $0x38] sm:$0xf] %vm254_vm1, %v252_v53  ;;  %v245_v56 = vpack.c.bf16 %v215_v54, %v215_v54 }
  0xc0   :  { %v156_v63 = vadd.f32 %v155_v55, %v48_v52 }
  0xc1   :  { %262 = vst.msk [vmem:[%s588_s5 + $0x1c] sm:$0xf] %vm254_vm1, %v245_v56 }
  0xc4   :  { %v235_v58 = vpop.f32.mrf.mxu2 }
  0xc5   :  { %v160_v59 = vpop.f32.mrf.mxu3  ;;  %v253_v60 = vpack.c.bf16 %v235_v58, %v235_v58 }
  0xc6   :  { %v161_v4 = vadd.f32 %v160_v59, %v58_v57 }
  0xc7   :  { %v157_v62 = vpop.f32.mrf.mxu0  ;;  %270 = vst.msk [vmem:[%s588_s5 + $0x3c] sm:$0xf] %vm254_vm1, %v253_v60  ;;  %s419_s5 = smov 4  }
  0xc8   :  { %v158_v0 = vadd.f32 %v157_v62, %v53_v61 }
  0xca   :  { %v366_v1 = vpack.c.bf16 %v158_v0, %v156_v63 }
  0xcc   :  { %367 = vst [vmem:[#allocation2] sm:$0xff] %v366_v1  }
  0xcd   :  { %v162_v3 = vpop.f32.mrf.mxu3 }
  0xce   :  { %v163_v5 = vadd.f32 %v162_v3, %v63_v2 }
  0xd0   :  { %v371_v6 = vpack.c.bf16 %v163_v5, %v161_v4 }
  0xd2   :  { %373 = vst [vmem:[#allocation2 + $0x8] sm:$0xff] %v371_v6  }
  0xd3   :  { %283 = dma.vmem_to_hbm [thread:$0]  %s276_s1, 256, %s278_s28, [#allocation3], %s418_s29, %s418_s29, %s419_s5  }
  0xd4   :  { %414 = dma.done.wait [#allocation3], 256  }
  0xd5   :  { %415 = vsyncadd [#allocation3], 4294967040 }
  0xd6   :  { %292 = vsyncpa [#allocation3], 1 }

</bundles_post_ra>
